<compile_context>
chip_gen: v7x
topology: tpu7x:2x2x1
jax: 0.10.0
libtpu: 0.0.40
codegen_flags: <defaults>
</compile_context>

<pallas_src>
import jax
import jax.numpy as jnp
from jax.experimental import pallas as pl
from jax.experimental.pallas import tpu as pltpu

EPS = 1e-5


def _instancenorm2d_kernel(x_ref, o_ref):
    # View: (TR, H*W). Each row is one (n, c) instance; normalize along the row.
    x = x_ref[...].astype(jnp.float32)
    mean = jnp.mean(x, axis=-1, keepdims=True)
    centered = x - mean
    # Two-pass (mean, then centered^2) keeps the numerically safe form;
    # biased variance (divide by H*W) like PyTorch.
    var = jnp.mean(centered * centered, axis=-1, keepdims=True)
    inv_std = jax.lax.rsqrt(var + EPS)
    o_ref[...] = (centered * inv_std).astype(o_ref.dtype)


def _pick_block_rows(rows: int, hw: int, itemsize: int) -> int:
    """Rows per block: as large as a ~2 MiB f32-working-set budget allows,
    sublane-aligned (multiple of 8) unless a single block covers all rows.
    With double-buffered in+out plus in-kernel f32 temps this stays well under
    the 32 MiB scoped-VMEM limit set below (safe on v5e/v6e/v7x)."""
    row_bytes = hw * max(itemsize, 4)  # kernel works in f32 regardless of input dtype
    target_block_bytes = 2 * 1024 * 1024
    tr = max(1, target_block_bytes // max(row_bytes, 1))
    tr = min(tr, rows)
    if tr < rows:
        tr = max(8, (tr // 8) * 8)  # (8, 128) sublane constraint on block_shape
        tr = min(tr, rows)
    # Favor >= 2 evenly-sized blocks so v7x can shard the "parallel" grid axis
    # across its 2 TensorCores when it costs nothing.
    if tr == rows and rows >= 16 and rows % 16 == 0:
        tr = rows // 2
    return tr


def instancenorm2d(x: jax.Array) -> jax.Array:
    """InstanceNorm2d forward. x: (N, C, H, W)."""
    N, C, H, W = x.shape
    rows, hw = N * C, H * W
    x2 = x.reshape(rows, hw)  # zero-cost reshape for contiguous NCHW
    tr = _pick_block_rows(rows, hw, x.dtype.itemsize)
    grid = (pl.cdiv(rows, tr),)

    out2 = pl.pallas_call(
        _instancenorm2d_kernel,
        out_shape=jax.ShapeDtypeStruct((rows, hw), x.dtype),
        grid_spec=pltpu.PrefetchScalarGridSpec(
            num_scalar_prefetch=0,
            grid=grid,
            in_specs=[pl.BlockSpec((tr, hw), lambda i: (i, 0))],
            out_specs=pl.BlockSpec((tr, hw), lambda i: (i, 0)),
        ),
        compiler_params=pltpu.CompilerParams(
            dimension_semantics=("parallel",),
            vmem_limit_bytes=32 * 1024 * 1024,
        ),
        cost_estimate=pl.CostEstimate(
            flops=5 * rows * hw,
            transcendentals=rows,
            bytes_accessed=2 * x.size * x.dtype.itemsize,
        ),
    )(x2)
    return out2.reshape(N, C, H, W)


class InstanceNorm2D:
    """Mirror of the PyTorch wrapper module. The original forward mutates
    `cloud.features`; here we take/return the feature array directly."""

    def __init__(self, num_features: int) -> None:
        self.num_features = num_features  # InstanceNorm2d(affine=False): no params

    def __repr__(self) -> str:
        return f"InstanceNorm2D(num_features: {self.num_features})"

    def __call__(self, features: jax.Array) -> jax.Array:
        assert features.shape[1] == self.num_features
        return instancenorm2d(features)


def _reference(x: jax.Array) -> jax.Array:
    xf = x.astype(jnp.float32)
    mean = jnp.mean(xf, axis=(2, 3), keepdims=True)
    var = jnp.mean((xf - mean) ** 2, axis=(2, 3), keepdims=True)
    return ((xf - mean) * jax.lax.rsqrt(var + EPS)).astype(x.dtype)


if __name__ == "__main__":
    key = jax.random.PRNGKey(0)
    N, C, H, W = 2, 4, 16, 16
    x = jax.random.normal(key, (N, C, H, W), dtype=jnp.float32) * 3.0 + 1.5

    layer = InstanceNorm2D(num_features=C)
    out = layer(x)
    out = jax.block_until_ready(out)

    ref = _reference(x)
    assert out.shape == (N, C, H, W)
    assert out.dtype == x.dtype
    assert jnp.max(jnp.abs(out - ref)) < 1e-4

    print("KERNEL_OK")
</pallas_src>

<mosaic_0001>
module attributes {stable_mosaic.version = 11 : i64} {
  func.func @_instancenorm2d_kernel(%arg0: i32, %arg1: memref<8x256xf32, #tpu.memory_space<vmem>>, %arg2: memref<8x256xf32, #tpu.memory_space<vmem>>) attributes {dimension_semantics = [#tpu.dimension_semantics<parallel>], iteration_bounds = array<i64: 1>, scalar_prefetch = 0 : i64, scratch_operands = 0 : i64, tpu.core_type = #tpu.core_type<tc>, window_params = [{transform_indices = @transform_0, window_bounds = array<i64: 8, 256>}, {transform_indices = @transform_1, window_bounds = array<i64: 8, 256>}]} {
    %c0 = arith.constant 0 : index
    %c0_0 = arith.constant 0 : index
    %0 = vector.load %arg1[%c0, %c0_0] : memref<8x256xf32, #tpu.memory_space<vmem>>, vector<8x256xf32>
    %cst = arith.constant dense<0.000000e+00> : vector<8xf32>
    %1 = vector.multi_reduction <add>, %0, %cst [1] : vector<8x256xf32> to vector<8xf32>
    %2 = vector.shape_cast %1 : vector<8xf32> to vector<8x1xf32>
    %cst_1 = arith.constant 2.560000e+02 : f32
    %3 = vector.broadcast %cst_1 : f32 to vector<8x1xf32>
    %4 = arith.divf %2, %3 : vector<8x1xf32>
    %5 = vector.broadcast %4 : vector<8x1xf32> to vector<8x256xf32>
    %6 = arith.subf %0, %5 : vector<8x256xf32>
    %7 = arith.mulf %6, %6 : vector<8x256xf32>
    %cst_2 = arith.constant dense<0.000000e+00> : vector<8xf32>
    %8 = vector.multi_reduction <add>, %7, %cst_2 [1] : vector<8x256xf32> to vector<8xf32>
    %9 = vector.shape_cast %8 : vector<8xf32> to vector<8x1xf32>
    %cst_3 = arith.constant 2.560000e+02 : f32
    %10 = vector.broadcast %cst_3 : f32 to vector<8x1xf32>
    %11 = arith.divf %9, %10 : vector<8x1xf32>
    %cst_4 = arith.constant 9.99999974E-6 : f32
    %12 = vector.broadcast %cst_4 : f32 to vector<8x1xf32>
    %13 = arith.addf %11, %12 : vector<8x1xf32>
    %14 = math.rsqrt %13 : vector<8x1xf32>
    %15 = vector.broadcast %14 : vector<8x1xf32> to vector<8x256xf32>
    %16 = arith.mulf %6, %15 : vector<8x256xf32>
    %c0_5 = arith.constant 0 : index
    %c0_6 = arith.constant 0 : index
    %17 = vector.load %arg2[%c0_5, %c0_6] : memref<8x256xf32, #tpu.memory_space<vmem>>, vector<8x256xf32>
    tpu.vector_store %arg2[%c0_5, %c0_6], %16 {strides = array<i32>} : memref<8x256xf32, #tpu.memory_space<vmem>>, vector<8x256xf32>,
    return
  }
  func.func @transform_0(%arg0: i32) -> (i32, i32) {
    %c0_i32 = arith.constant 0 : i32
    %c0_i32_0 = arith.constant 0 : i32
    return %arg0, %c0_i32 : i32, i32
  }
  func.func @transform_1(%arg0: i32) -> (i32, i32) {
    %c0_i32 = arith.constant 0 : i32
    %c0_i32_0 = arith.constant 0 : i32
    return %arg0, %c0_i32 : i32, i32
  }
}

</mosaic_0001>

<bundles_post_ra>
// kernel: tpu_custom_call.1
= control target key start
LH: loop header
LB: loop body
LE: loop exit
PB: predicated region body
PF: predicated region fallthrough
CT: control target
= control target key end

     0   :  { %6 = vsyncpa [#allocation3], 0  ;;  %s145_s0 = inlined_call_operand.hbm [shape: f32[8,256], index: 0, kind: input, shape index: {}]   ;;  %s146_s1 = inlined_call_operand.hbm [shape: f32[8,256], index: 1, kind: output, shape index: {}]  }
   0x1   :  { %7 = vsyncpa [#allocation4], 0  ;;  %s109_s6 = smov [#allocation2]   ;;  %s61_s10 = scalar_lea.hbm %s145_s0, 256 }
   0x2   :  { %s14_s7 = sshll.u32 %s109_s6, 4  ;;  %p62_p0 = scmp.ne.s32.totalorder %s145_s0, %s61_s10  ;;  %s15_s7 = int_to_ptr.vmem [resolvable:$true] %s14_s7 }
   0x3   :  { %p65_p1 = scmp.lt.u32.totalorder %s61_s10, %s145_s0 }
   0x5   :  { %p67_p2 = pnand %p65_p1, %p62_p0 }
   0x7   :  { %70 = shalt.err (!%p67_p2)
}
   0x8   :  { %s71_s15 = scalar_lea.vmem %s15_s7, 256  ;;  %p76_p4 = scmp.lt.s32.totalorder %s15_s7, %s15_s7 }
   0x9   :  { %p72_p3 = scmp.ne.s32.totalorder %s15_s7, %s71_s15  ;;  %p77_p5 = scmp.lt.s32.totalorder %s71_s15, %s71_s15 }
   0xb   :  { %p78_p6 = por %p77_p5, %p76_p4 }
   0xd   :  { %p79_p7 = pnand %p78_p6, %p72_p3 }
   0xf   :  { %82 = shalt.err (!%p79_p7)
}
  0x10   :  { %17 = dma.hbm_to_vmem [thread:$0]  %s145_s0, 256, %s15_s7, [#allocation3]  }
  0x11   :  { %105 = dma.done.wait [#allocation3], 256  }
  0x12   :  { %106 = vsyncadd [#allocation3], 4294967040  ;;  %v21_v0 = vld [vmem:[#allocation2] sm:$0xff]  ;;  %v22_v1 = vld [vmem:[#allocation2 + $0x8] sm:$0xff]  ;;  %s110_s18 = smov [#allocation5]  }
  0x13   :  { %v23_v2 = vadd.f32 %v22_v1, %v21_v0  ;;  %s48_s0 = sshll.u32 %s110_s18, 4  ;;  %s49_s0 = int_to_ptr.vmem [resolvable:$true] %s48_s0 }
  0x14   :  { %s83_s19 = scalar_lea.vmem %s49_s0, 256  ;;  %p88_p9 = scmp.lt.s32.totalorder %s49_s0, %s49_s0 }
  0x15   :  { %24 = vadd.xlane.f32.xlu0 %v23_v2  ;;  %p84_p8 = scmp.ne.s32.totalorder %s49_s0, %s83_s19  ;;  %p89_p10 = scmp.lt.s32.totalorder %s83_s19, %s83_s19 }
  0x17   :  { %p90_p11 = por %p89_p10, %p88_p9 }
  0x19   :  { %p91_p12 = pnand %p90_p11, %p84_p8 }
  0xa2   :  { %v25_v3 = vpop.xlane.xlu0 %24 }
  0xa3   :  { %v27_v4 = vmul.f32 0.00390625, %v25_v3 }
  0xa5   :  { %v28_v5 = vsub.f32 %v21_v0, %v27_v4  ;;  %v29_v6 = vsub.f32 %v22_v1, %v27_v4 }
  0xa7   :  { %v30_v7 = vmul.f32 %v28_v5, %v28_v5  ;;  %v31_v8 = vmul.f32 %v29_v6, %v29_v6 }
  0xa9   :  { %v32_v9 = vadd.f32 %v31_v8, %v30_v7 }
  0xab   :  { %33 = vadd.xlane.f32.xlu0 %v32_v9 }
 0x138   :  { %v34_v10 = vpop.xlane.xlu0 %33 }
 0x139   :  { %v35_v11 = vmul.f32 0.00390625, %v34_v10 }
 0x13b   :  { %v36_v12 = vadd.f32 1e-05, %v35_v11 }
 0x13d   :  { %59 = vrsqrt.f32 %v36_v12 }
 0x147   :  { %v60_v13 = vpop.eup %59 }
 0x148   :  { %v38_v14 = vmul.f32 %v60_v13, %v28_v5  ;;  %v39_v15 = vmul.f32 %v60_v13, %v29_v6 }
 0x14a   :  { %40 = vst [vmem:[#allocation5] sm:$0xff] %v38_v14  ;;  %41 = vst [vmem:[#allocation5 + $0x8] sm:$0xff] %v39_v15 }
 0x14b   :  { %94 = shalt.err (!%p91_p12)
}
 0x14c   :  { %s95_s22 = scalar_lea.hbm %s146_s1, 256 }
 0x14d   :  { %p96_p13 = scmp.ne.s32.totalorder %s146_s1, %s95_s22  ;;  %p99_p0 = scmp.lt.u32.totalorder %s95_s22, %s146_s1 }
 0x14f   :  { %p101_p1 = pnand %p99_p0, %p96_p13 }
 0x151   :  { %104 = shalt.err (!%p101_p1)
}
 0x152   :  { %51 = dma.vmem_to_hbm [thread:$0]  %s49_s0, 256, %s146_s1, [#allocation4]  }
 0x153   :  { %107 = dma.done.wait [#allocation4], 256  }
 0x154   :  { %108 = vsyncadd [#allocation4], 4294967040 }
 0x155   :  { %55 = vsyncpa [#allocation3], 1 }
 0x156   :  { %56 = vsyncpa [#allocation4], 1 }

</bundles_post_ra>
